<compile_context>
chip_gen: v7x
topology: tpu7x:2x2x1
jax: 0.10.0
libtpu: 0.0.40
codegen_flags: <defaults>
</compile_context>

<pallas_src>
import jax
import jax.numpy as jnp
from jax.experimental import pallas as pl
from jax.experimental.pallas import tpu as pltpu


def _film_kernel(x_ref, scale_ref, shift_ref, o_ref):
    # x_ref/o_ref: (TR, HW); scale_ref/shift_ref: (TR, 1) -> lane broadcast.
    o_ref[...] = x_ref[...] * scale_ref[...] + shift_ref[...]


def _pick_row_tile(R, HW, itemsize, sublane, max_tile_bytes=4 << 20):
    """Largest multiple-of-`sublane` divisor of R whose (TR, HW) tile fits the
    byte budget, preferring a choice that keeps >= 2 grid steps (v7x 2-TC)."""
    if R % sublane != 0:
        return R  # full-extent block is always legal
    candidates = [
        tr for tr in range(sublane, R + 1, sublane)
        if R % tr == 0 and tr * HW * itemsize <= max_tile_bytes
    ]
    if not candidates:
        return sublane
    multi_step = [tr for tr in candidates if R // tr >= 2]
    return max(multi_step) if multi_step else max(candidates)


def point_film_conv(x, task_labels, num_samples, scales, shifts):
    """x: (num_samples*B, C, H, W) NCHW; task_labels: (B,) int32;
    scales/shifts: (tasks, width) with width == C."""
    N, C, H, W = x.shape
    B = task_labels.shape[0]
    assert N == num_samples * B
    tasks, width = scales.shape
    assert width == C

    HW = H * W
    assert HW % 128 == 0, "pad spatial dims so H*W is a multiple of 128"
    # TODO(synk): for general shapes, pad HW up to a multiple of 128 in the
    # wrapper instead of asserting (keeps output stores lane-dense).

    # --- hoisted embedding gather (cheap, done by XLA outside the kernel) ---
    # torch's .repeat(num_samples, ...) means output index n uses label n % B,
    # which is exactly jnp.tile(task_labels, num_samples).
    labels_n = jnp.tile(task_labels, num_samples)                    # (N,)
    scale_rows = scales[labels_n].astype(x.dtype).reshape(N * C, 1)  # (N*C, 1)
    shift_rows = shifts[labels_n].astype(x.dtype).reshape(N * C, 1)  # (N*C, 1)

    # --- fold (sample, channel) onto the sublane axis ---
    R = N * C
    x2 = x.reshape(R, HW)

    itemsize = jnp.dtype(x.dtype).itemsize
    sublane = {1: 32, 2: 16, 4: 8}.get(itemsize, 8)
    TR = _pick_row_tile(R, HW, itemsize, sublane)
    grid = (R // TR,)

    out2 = pl.pallas_call(
        _film_kernel,
        out_shape=jax.ShapeDtypeStruct((R, HW), x.dtype),
        grid_spec=pl.GridSpec(
            grid=grid,
            in_specs=[
                pl.BlockSpec((TR, HW), lambda i: (i, 0)),   # x rows
                pl.BlockSpec((TR, 1), lambda i: (i, 0)),    # per-row scale
                pl.BlockSpec((TR, 1), lambda i: (i, 0)),    # per-row shift
            ],
            out_specs=pl.BlockSpec((TR, HW), lambda i: (i, 0)),
        ),
        compiler_params=pltpu.CompilerParams(
            dimension_semantics=("parallel",)),
    )(x2, scale_rows, shift_rows)

    return out2.reshape(N, C, H, W)


def point_film_conv_ref(x, task_labels, num_samples, scales, shifts):
    """Pure-JAX reference mirroring the PyTorch forward (conv=True)."""
    width = scales.shape[1]
    sv = scales[task_labels].reshape(-1, width, 1, 1)
    bv = shifts[task_labels].reshape(-1, width, 1, 1)
    sv = jnp.tile(sv, (num_samples, 1, 1, 1))
    bv = jnp.tile(bv, (num_samples, 1, 1, 1))
    return x * sv + bv


if __name__ == "__main__":
    key = jax.random.PRNGKey(0)
    k_x, k_s, k_b = jax.random.split(key, 3)

    tasks = 3
    width = 4          # == channel count C
    B = 2              # number of task labels in the batch
    num_samples = 2
    H = W = 16
    N = num_samples * B

    # Module __init__ sets scales=1.0, shifts=0.0; use deterministic random
    # values instead so the FiLM transform is actually exercised.
    scales = 1.0 + 0.1 * jax.random.normal(k_s, (tasks, width), dtype=jnp.float32)
    shifts = 0.1 * jax.random.normal(k_b, (tasks, width), dtype=jnp.float32)

    x = jax.random.normal(k_x, (N, width, H, W), dtype=jnp.float32)
    task_labels = jnp.array([0, 2], dtype=jnp.int32)

    out = point_film_conv(x, task_labels, num_samples, scales, shifts)
    out = jax.block_until_ready(out)

    ref = point_film_conv_ref(x, task_labels, num_samples, scales, shifts)
    assert out.shape == ref.shape
    assert jnp.allclose(out, ref, atol=1e-6, rtol=1e-6), "mismatch vs reference"

    # TODO(synk): non-conv branch (x: (num_samples, B, width)) is a trivial
    # variant of the same elementwise kernel and is not wired up here.
    print("KERNEL_OK")
</pallas_src>

<mosaic_0001>
module attributes {stable_mosaic.version = 11 : i64} {
  func.func @_film_kernel(%arg0: i32, %arg1: memref<8x256xf32, #tpu.memory_space<vmem>>, %arg2: memref<8x1xf32, #tpu.memory_space<vmem>>, %arg3: memref<8x1xf32, #tpu.memory_space<vmem>>, %arg4: memref<8x256xf32, #tpu.memory_space<vmem>>) attributes {dimension_semantics = [#tpu.dimension_semantics<parallel>], iteration_bounds = array<i64: 2>, scalar_prefetch = 0 : i64, scratch_operands = 0 : i64, tpu.core_type = #tpu.core_type<tc>, window_params = [{transform_indices = @transform_0, window_bounds = array<i64: 8, 256>}, {transform_indices = @transform_1, window_bounds = array<i64: 8, 1>}, {transform_indices = @transform_2, window_bounds = array<i64: 8, 1>}, {transform_indices = @transform_3, window_bounds = array<i64: 8, 256>}]} {
    %c0 = arith.constant 0 : index
    %c0_0 = arith.constant 0 : index
    %0 = vector.load %arg1[%c0, %c0_0] : memref<8x256xf32, #tpu.memory_space<vmem>>, vector<8x256xf32>
    %c0_1 = arith.constant 0 : index
    %c0_2 = arith.constant 0 : index
    %1 = vector.load %arg2[%c0_1, %c0_2] : memref<8x1xf32, #tpu.memory_space<vmem>>, vector<8x1xf32>
    %2 = vector.broadcast %1 : vector<8x1xf32> to vector<8x256xf32>
    %3 = arith.mulf %0, %2 : vector<8x256xf32>
    %c0_3 = arith.constant 0 : index
    %c0_4 = arith.constant 0 : index
    %4 = vector.load %arg3[%c0_3, %c0_4] : memref<8x1xf32, #tpu.memory_space<vmem>>, vector<8x1xf32>
    %5 = vector.broadcast %4 : vector<8x1xf32> to vector<8x256xf32>
    %6 = arith.addf %3, %5 : vector<8x256xf32>
    %c0_5 = arith.constant 0 : index
    %c0_6 = arith.constant 0 : index
    %7 = vector.load %arg4[%c0_5, %c0_6] : memref<8x256xf32, #tpu.memory_space<vmem>>, vector<8x256xf32>
    tpu.vector_store %arg4[%c0_5, %c0_6], %6 {strides = array<i32>} : memref<8x256xf32, #tpu.memory_space<vmem>>, vector<8x256xf32>,
    return
  }
  func.func @transform_0(%arg0: i32) -> (i32, i32) {
    %c0_i32 = arith.constant 0 : i32
    %c0_i32_0 = arith.constant 0 : i32
    return %arg0, %c0_i32 : i32, i32
  }
  func.func @transform_1(%arg0: i32) -> (i32, i32) {
    %c0_i32 = arith.constant 0 : i32
    %c0_i32_0 = arith.constant 0 : i32
    return %arg0, %c0_i32 : i32, i32
  }
  func.func @transform_2(%arg0: i32) -> (i32, i32) {
    %c0_i32 = arith.constant 0 : i32
    %c0_i32_0 = arith.constant 0 : i32
    return %arg0, %c0_i32 : i32, i32
  }
  func.func @transform_3(%arg0: i32) -> (i32, i32) {
    %c0_i32 = arith.constant 0 : i32
    %c0_i32_0 = arith.constant 0 : i32
    return %arg0, %c0_i32 : i32, i32
  }
}

</mosaic_0001>

<bundles_post_ra>
// kernel: tpu_custom_call.1
= control target key start
LH: loop header
LB: loop body
LE: loop exit
PB: predicated region body
PF: predicated region fallthrough
CT: control target
= control target key end

     0   :  { %8 = vsyncpa [#allocation3], 0  ;;  %s570_s0 = inlined_call_operand.vmem [shape: f32[16,256], index: 0, kind: input, shape index: {}]   ;;  %s571_s1 = inlined_call_operand.vmem [shape: f32[16,1], index: 1, kind: input, shape index: {}]   ;;  %s572_s2 = inlined_call_operand.vmem [shape: f32[16,1], index: 2, kind: input, shape index: {}]   ;;  %s573_s3 = inlined_call_operand.hbm [shape: f32[16,256], index: 3, kind: output, shape index: {}]  }
   0x1   :  { %10 = vsyncpa [#allocation3 + $0x1], 0  ;;  %s464_s12 = smov 0   ;;  %s466_s13 = smov 0  }
   0x2   :  { %s468_s14 = smov 0   ;;  %s470_s15 = smov 0  }
   0x3 LB: > { %s485_s16 = sadd.s32 4294967295, %s440_s15   ;;  %s321_s17 = sadd.s32 4294967294, %s440_s15   ;;  %s440_s15 = sphi %s470_s15, %s579_s15   ;;  %s436_s14 = sphi %s468_s14, %s578_s14   ;;  %s432_s13 = sphi %s466_s13, %s577_s13   ;;  %s428_s12 = sphi %s464_s12, %s576_s12  }
   0x4   : > { %s489_s18 = sadd.s32 1, %s440_s15   ;;  %s101_s19 = sadd.s32 1, %s436_s14 }
   0x5   : > { %s98_s20 = ssub.s32 %s440_s15, %s489_s18  ;;  %p111_p0 = scmp.ne.s32.totalorder %s436_s14, %s432_s13 }
   0x6   : > { %p99_p1 = scmp.eq.s32.totalorder %s98_s20, 0  ;;  %p112_p2 = scmp.eq.s32.totalorder %s485_s16, 1 }
   0x7   : > { %p117_p3 = scmp.ne.s32.totalorder %s432_s13, %s428_s12  ;;  %p118_p4 = scmp.eq.s32.totalorder %s321_s17, 1 }
   0x8   : > { %s500_s21 = scalar_select %p99_p1, %s436_s14, %s101_s19  }
   0x9   : > { %p502_p5 = por %p112_p2, %p111_p0  ;;  %p506_p6 = por %p118_p4, %p117_p3 }
   0xa   : > { %p324_p7 = scmp.ge.s32.totalorder %s440_s15, 1  ;;  %p158_p8 = scmp.lt.s32.totalorder %s440_s15, 3 }
   0xc   : > { %p159_p9 = pnand %p324_p7, %p158_p8 }
   0xd   : > { %p190_p10 = scmp.lt.s32.totalorder (!%p159_p9), %s485_s16, 1  ;;  %v442_v0 = vmov (!%p159_p9), 0   ;;  %s187_s5 = sand.u32 (!%p159_p9), 1, %s432_s13  }
   0xe   : > { %162 = sbr.rel (%p159_p9) target bundleno = 174 (0xae), region = 32  ;;  %377 = vset.pattern.permute.xlu0 (!%p159_p9), %v442_v0  ;;  %s325_s7 = sshll.u32 (!%p159_p9), %s187_s5, 4 }
   0xf   : > { %s336_s11 = sshll.u32 (!%p159_p9), %s485_s16, 8  ;;  %s189_s17 = scalar_lea.vmem (!%p159_p9), [#allocation2], %s325_s7 }
  0x10   : > { %s238_s19 = sshll.u32 (!%p159_p9), %s189_s17, 4  ;;  %s443_s27 = smov (!%p159_p9), [#allocation2]   ;;  %s530_s19 = int_to_ptr.vmem [resolvable:$true] %s238_s19 }
  0x11   : > { %s378_s26 = scalar_lea.vmem (!%p159_p9), %s530_s19, 256 }
  0x12   : > { %p379_p11 = scmp.ne.s32.totalorder (!%p159_p9), %s530_s19, %s378_s26 }
  0x14   : > { %p380_p12 = pnand (!%p159_p9), %p379_p11, %p502_p5 }
  0x15   : > { %s191_s24 = scalar_select %p190_p10, %s485_s16, 1 }
  0x16   : > { %s224_s16 = scalar_lea.sflag [#allocation3], %s187_s5  ;;  %p381_p13 = pneg %p380_p12 }
  0x17   : > { %s328_s25 = sshll.u32 %s191_s24, 3  ;;  %s335_s6 = sshll.u32 %s191_s24, 4 }
  0x18   : > { %s198_s28 = scalar_lea.vmem %s571_s1, %s328_s25  ;;  %s202_s4 = scalar_lea.vmem %s572_s2, %s328_s25 }
  0x19   : > { %v205_v1 = vld [vmem:[%s198_s28] sm:$0xff]  ;;  %s194_s10 = scalar_lea.vmem %s570_s0, %s335_s6  ;;  %s528_s24 = scalar_lea.hbm %s573_s3, %s336_s11 }
  0x1a   : > { %208 = vperm.xlu0 %377, %v205_v1   ;;  %v213_v2 = vld [vmem:[%s202_s4] sm:$0xff]  ;;  %v204_v5 = vld [vmem:[%s194_s10 + $0x8] sm:$0xff]  ;;  %s382_s28 = sshll.u32 %s443_s27, 4  ;;  %s383_s28 = int_to_ptr.vmem [resolvable:$false] %s382_s28 }
  0x1b   : > { %v203_v4 = vld [vmem:[%s194_s10] sm:$0xff]  ;;  %s384_s29 = scalar_lea.vmem %s383_s28, 512  ;;  %p385_p0 = scmp.lt.s32.totalorder %s530_s19, %s383_s28 }
  0x1c   : > { %p386_p1 = scmp.lt.s32.totalorder %s384_s29, %s378_s26 }
  0x1e   : > { %216 = vperm.xlu0 %377, %v213_v2   ;;  %p387_p2 = por %p386_p1, %p385_p0 }
  0x20   : > { %p388_p3 = pnand %p387_p2, %p381_p13 }
  0x99   : > { %v209_v3 = vpop.permute.xlu0 %208 }
  0x9a   : > { %v211_v6 = vmul.f32 %v209_v3, %v203_v4  ;;  %v212_v7 = vmul.f32 %v209_v3, %v204_v5 }
  0x9d   : > { %v217_v8 = vpop.permute.xlu0 %216 }
  0x9e   : > { %v219_v9 = vadd.f32 %v217_v8, %v211_v6  ;;  %v220_v10 = vadd.f32 %v217_v8, %v212_v7 }
  0xa0   : > { %221 = vst [vmem:[%s189_s17] sm:$0xff] %v219_v9  ;;  %222 = vst [vmem:[%s189_s17 + $0x8] sm:$0xff] %v220_v10 }
  0xa1   : > { %391 = shalt.err (!%p388_p3)
}
  0xa2   : > { %s392_s30 = scalar_lea.hbm %s528_s24, 256  ;;  %s396_s6 = scalar_lea.hbm %s573_s3, 512 }
  0xa3   : > { %p393_p4 = scmp.ne.s32.totalorder %s528_s24, %s392_s30  ;;  %p397_p9 = scmp.lt.u32.totalorder %s528_s24, %s573_s3 }
  0xa4   : > { %p398_p10 = scmp.lt.u32.totalorder %s396_s6, %s392_s30  ;;  %p400_p12 = scmp.lt.u32.totalorder %s392_s30, %s528_s24 }
  0xa5   : > { %p394_p7 = pnand %p393_p4, %p502_p5 }
  0xa6   : > { %p399_p11 = por %p398_p10, %p397_p9 }
  0xa7   : > { %p395_p8 = pneg %p394_p7 }
  0xa8   : > { %p401_p13 = por %p400_p12, %p399_p11 }
  0xaa   : > { %p402_p0 = pnand %p401_p13, %p395_p8 }
  0xac   : > { %405 = shalt.err (!%p402_p0)
}
  0xad   : > { %337 = dma.vmem_to_hbm [thread:$0]  (%p502_p5), %s530_s19, 256, %s528_s24, %s224_s16  }
  0xae PF: > { %p343_p1 = scmp.ge.s32.totalorder %s440_s15, 2  ;;  %s250_s9 = sand.u32 1, %s428_s12  }
  0xaf   : > { %s251_s10 = scalar_lea.sflag [#allocation3], %s250_s9 }
  0xb0   : > { %p340_p2 = pnand %p343_p1, %p506_p6 }
  0xb2   : > { %423 = dma.done.wait (!%p340_p2), %s251_s10, 256  }
  0xb3   : > { %425 = vsyncadd (!%p340_p2), %s251_s10, 4294967040  ;;  %p13_p3 = scmp.ge.s32.totalorder %s489_s18, 4   ;;  %s576_s12 = smov %s432_s13 }
  0xb4   : > { %s577_s13 = smov %s436_s14  ;;  %s578_s14 = smov %s500_s21 }
  0xb5   : > { %s579_s15 = smov %s489_s18  ;;  %15 = sbr.rel (!%p13_p3) target bundleno = 3 (0x3), region = 73 }
  0xbc   :  { %256 = vsyncpa [#allocation3], 1 }
  0xbd   :  { %258 = vsyncpa [#allocation3 + $0x1], 1 }

</bundles_post_ra>
